<compile_context>
chip_gen: v7x
topology: tpu7x:2x2x1
jax: 0.10.0
libtpu: 0.0.40
codegen_flags: <defaults>
</compile_context>

<pallas_src>
import jax
import jax.numpy as jnp
from jax import lax
from jax.experimental import pallas as pl
from jax.experimental.pallas import tpu as pltpu


def cosmo_kernel(fw_ref, x_ref, w1_ref, b1_ref, w2_ref, b2_ref, out_ref):
    """One grid step = one batch tile.  Loops over modalities in-kernel.

    fw_ref : (M, P)        SMEM   fusion weights (normalized over modalities), f32
    x_ref  : (M, Bt, Din)  VMEM   per-modality backbone features, bf16
    w1_ref : (M, Din, D)   VMEM   first Linear weights, bf16
    b1_ref : (M, 1, D)     VMEM   first Linear bias, f32
    w2_ref : (M, D, D)     VMEM   second Linear weights, bf16
    b2_ref : (M, 1, D)     VMEM   second Linear bias, f32
    out_ref: (Bt, P*D)     VMEM   fused features, f32 (lane-dense, full-tile stores)
    """
    M = x_ref.shape[0]
    D = w2_ref.shape[-1]
    P = fw_ref.shape[-1]

    # M and P are small static ints -> loops unroll at trace time.
    for m in range(M):
        x = x_ref[m]                                                    # (Bt, Din) bf16
        # projection head: Linear -> ReLU -> Linear (bf16 MXU operands, f32 accumulate)
        h = jnp.dot(x, w1_ref[m], preferred_element_type=jnp.float32) + b1_ref[m]
        h = jnp.maximum(h, 0.0)                                         # f32
        z = jnp.dot(h.astype(jnp.bfloat16), w2_ref[m],
                    preferred_element_type=jnp.float32) + b2_ref[m]     # (Bt, D) f32
        # F.normalize(dim=1), eps=1e-12:  z / max(||z||, eps) == z * rsqrt(max(||z||^2, eps^2))
        inv = lax.rsqrt(jnp.maximum(jnp.sum(z * z, axis=-1, keepdims=True), 1e-24))
        zn = z * inv                                                    # (Bt, D) f32

        # cosmo_rand_fusion: out[:, p*D:(p+1)*D] (+)= fw[m, p] * zn
        # Static, 128-aligned column slices -> full-tile unmasked stores / RMW.
        for p in range(P):
            contrib = fw_ref[m, p] * zn
            if m == 0:
                out_ref[:, p * D:(p + 1) * D] = contrib       # init from first modality
            else:
                out_ref[:, p * D:(p + 1) * D] += contrib


def _pick_block_b(B):
    """Largest multiple-of-8 divisor of B, capped at 256, preferring >=2 grid steps
    (v7x megacore).  Falls back to the full batch (block == full dim is always legal)."""
    divisors = [d for d in range(8, min(B, 256) + 1, 8) if B % d == 0]
    if not divisors:
        return B
    two_step = [d for d in divisors if B // d >= 2]
    return max(two_step) if two_step else max(divisors)


def _build_cosmo_call(M, B, Din, D, P, block_b, single_buffer_weights):
    nb = B // block_b

    wkw = {}
    if single_buffer_weights and hasattr(pl, "Buffered"):
        # Constant index_map -> weights never re-fetched; 1 buffer halves their VMEM cost.
        wkw = dict(pipeline_mode=pl.Buffered(1))

    # VMEM footprint estimate (bytes): weights (+buffers) + 2x x tile + 2x out tile.
    w_bufs = 1 if wkw else 2
    bytes_w = w_bufs * (M * Din * D * 2 + M * D * D * 2 + 2 * M * D * 4)
    bytes_x = 2 * M * block_b * Din * 2
    bytes_out = 2 * block_b * P * D * 4
    needed = int(1.5 * (bytes_w + bytes_x + bytes_out)) + (2 << 20)
    vmem_limit = min(max(needed, 16 << 20), 64 << 20)   # stay under v7x physical VMEM

    return pl.pallas_call(
        cosmo_kernel,
        out_shape=jax.ShapeDtypeStruct((B, P * D), jnp.float32),
        grid=(nb,),
        in_specs=[
            pl.BlockSpec(memory_space=pltpu.MemorySpace.SMEM),            # fw (scalars)
            pl.BlockSpec((M, block_b, Din), lambda i: (0, i, 0)),         # x batch tile
            pl.BlockSpec((M, Din, D), lambda i: (0, 0, 0), **wkw),        # W1 (resident)
            pl.BlockSpec((M, 1, D),   lambda i: (0, 0, 0), **wkw),        # b1
            pl.BlockSpec((M, D, D),   lambda i: (0, 0, 0), **wkw),        # W2 (resident)
            pl.BlockSpec((M, 1, D),   lambda i: (0, 0, 0), **wkw),        # b2
        ],
        # (block_b, P*D): sublane = block_b (mult. of 8 / full), lane = P*D (mult. of 128)
        out_specs=pl.BlockSpec((block_b, P * D), lambda i: (i, 0)),
        compiler_params=pltpu.CompilerParams(
            dimension_semantics=("parallel",),          # independent batch tiles
            vmem_limit_bytes=vmem_limit,
        ),
    )


def cosmo_forward(x, w1, b1, w2, b2, fw, *, block_b=None):
    """x: (M, B, Din), w1: (M, Din, D), b1: (M, 1, D), w2: (M, D, D), b2: (M, 1, D),
    fw: (M, P).  Returns fused features (B, P, D) — same layout as the torch module."""
    M, B, Din = x.shape
    D = w1.shape[-1]
    P = fw.shape[-1]

    if block_b is None:
        block_b = _pick_block_b(B)
    assert B % block_b == 0, "batch tile must divide the batch"

    # bf16 MXU feed + bf16 weight storage (halves weight DMA & resident VMEM).
    x_bf = x.astype(jnp.bfloat16)
    w1_bf = w1.astype(jnp.bfloat16)
    w2_bf = w2.astype(jnp.bfloat16)
    b1_f32 = b1.astype(jnp.float32)
    b2_f32 = b2.astype(jnp.float32)
    fw_f32 = fw.astype(jnp.float32)

    args = (fw_f32, x_bf, w1_bf, b1_f32, w2_bf, b2_f32)
    try:
        out_flat = _build_cosmo_call(M, B, Din, D, P, block_b, True)(*args)
    except Exception:
        # Fallback if pipeline_mode isn't accepted on top-level BlockSpecs here.
        out_flat = _build_cosmo_call(M, B, Din, D, P, block_b, False)(*args)

    # Free contiguous reshape to the torch layout [b, num_positive, emb_dim].
    return out_flat.reshape(B, P, D)


def cosmo_ref(x, w1, b1, w2, b2, fw):
    """Pure-JAX f32 reference mirroring the PyTorch semantics."""
    h = jnp.maximum(jnp.einsum("mbi,mid->mbd", x, w1) + b1, 0.0)
    z = jnp.einsum("mbd,mde->mbe", h, w2) + b2
    zn = z / jnp.maximum(jnp.linalg.norm(z, axis=-1, keepdims=True), 1e-12)
    return jnp.einsum("mp,mbd->bpd", fw, zn)


if __name__ == "__main__":
    # Small synthetic config: 2 modalities, batch 8, in_fc_dim 32, emb_dim 128, num_positive 4
    M, B, DIN, D, P = 2, 8, 32, 128, 4

    key = jax.random.PRNGKey(0)
    kx, kw1, kb1, kw2, kb2, kfw = jax.random.split(key, 6)

    # "backbone output" per modality
    x = jax.random.normal(kx, (M, B, DIN), dtype=jnp.float32)

    # deterministic projection-head parameters (Linear(in,emb), Linear(emb,emb) per modality)
    w1 = jax.random.normal(kw1, (M, DIN, D), dtype=jnp.float32) * (1.0 / jnp.sqrt(DIN))
    b1 = jax.random.normal(kb1, (M, 1, D), dtype=jnp.float32) * 0.01
    w2 = jax.random.normal(kw2, (M, D, D), dtype=jnp.float32) * (1.0 / jnp.sqrt(D))
    b2 = jax.random.normal(kb2, (M, 1, D), dtype=jnp.float32) * 0.01

    # fusion weights: rand(M, P) normalized over modality axis (torch.rand analogue)
    fw_raw = jax.random.uniform(kfw, (M, P), dtype=jnp.float32)
    fw = fw_raw / jnp.sum(fw_raw, axis=0, keepdims=True)

    out = cosmo_forward(x, w1, b1, w2, b2, fw)
    out = jax.block_until_ready(out)

    ref = jax.block_until_ready(cosmo_ref(x, w1, b1, w2, b2, fw))
    assert out.shape == (B, P, D)
    assert jnp.allclose(out, ref, atol=2e-3, rtol=2e-3), "mismatch vs JAX reference"

    print("KERNEL_OK")
</pallas_src>

<mosaic_0001>
module attributes {stable_mosaic.version = 11 : i64} {
  func.func @cosmo_kernel(%arg0: i32, %arg1: memref<2x4xf32, #tpu.memory_space<smem>>, %arg2: memref<2x8x32xbf16, #tpu.memory_space<vmem>>, %arg3: memref<2x32x128xbf16, #tpu.memory_space<vmem>>, %arg4: memref<2x1x128xf32, #tpu.memory_space<vmem>>, %arg5: memref<2x128x128xbf16, #tpu.memory_space<vmem>>, %arg6: memref<2x1x128xf32, #tpu.memory_space<vmem>>, %arg7: memref<8x512xf32, #tpu.memory_space<vmem>>) attributes {dimension_semantics = [#tpu.dimension_semantics<parallel>], iteration_bounds = array<i64: 1>, scalar_prefetch = 0 : i64, scratch_operands = 0 : i64, tpu.core_type = #tpu.core_type<tc>, window_params = [{transform_indices = @transform_0, window_bounds = array<i64: 2, 4>}, {transform_indices = @transform_1, window_bounds = array<i64: 2, 8, 32>}, {pipeline_mode = #tpu.pipeline_mode<synchronous>, transform_indices = @transform_2, window_bounds = array<i64: 2, 32, 128>}, {pipeline_mode = #tpu.pipeline_mode<synchronous>, transform_indices = @transform_3, window_bounds = array<i64: 2, 1, 128>}, {pipeline_mode = #tpu.pipeline_mode<synchronous>, transform_indices = @transform_4, window_bounds = array<i64: 2, 128, 128>}, {pipeline_mode = #tpu.pipeline_mode<synchronous>, transform_indices = @transform_5, window_bounds = array<i64: 2, 1, 128>}, {transform_indices = @transform_6, window_bounds = array<i64: 8, 512>}]} {
    %c0 = arith.constant 0 : index
    %c0_0 = arith.constant 0 : index
    %c0_1 = arith.constant 0 : index
    %0 = vector.load %arg2[%c0, %c0_0, %c0_1] : memref<2x8x32xbf16, #tpu.memory_space<vmem>>, vector<1x8x32xbf16>
    %1 = vector.shape_cast %0 : vector<1x8x32xbf16> to vector<8x32xbf16>
    %c0_2 = arith.constant 0 : index
    %c0_3 = arith.constant 0 : index
    %c0_4 = arith.constant 0 : index
    %2 = vector.load %arg3[%c0_2, %c0_3, %c0_4] : memref<2x32x128xbf16, #tpu.memory_space<vmem>>, vector<1x32x128xbf16>
    %3 = vector.shape_cast %2 : vector<1x32x128xbf16> to vector<32x128xbf16>
    %cst = arith.constant dense<0.000000e+00> : vector<8x128xf32>
    %4 = tpu.matmul %1, %3, %cst {dimension_numbers = #tpu.dot_dimension_numbers<[1], [0], [0], [1], [0, 0, 1, 1], [], []>} : vector<8x32xbf16>, vector<32x128xbf16>, vector<8x128xf32> -> vector<8x128xf32>
    %c0_5 = arith.constant 0 : index
    %c0_6 = arith.constant 0 : index
    %c0_7 = arith.constant 0 : index
    %5 = vector.load %arg4[%c0_5, %c0_6, %c0_7] : memref<2x1x128xf32, #tpu.memory_space<vmem>>, vector<1x1x128xf32>
    %6 = vector.shape_cast %5 : vector<1x1x128xf32> to vector<1x128xf32>
    %7 = vector.broadcast %6 : vector<1x128xf32> to vector<8x128xf32>
    %8 = arith.addf %4, %7 : vector<8x128xf32>
    %cst_8 = arith.constant 0.000000e+00 : f32
    %9 = vector.broadcast %cst_8 : f32 to vector<8x128xf32>
    %10 = arith.maximumf %8, %9 : vector<8x128xf32>
    %11 = arith.truncf %10 : vector<8x128xf32> to vector<8x128xbf16>
    %c0_9 = arith.constant 0 : index
    %c0_10 = arith.constant 0 : index
    %c0_11 = arith.constant 0 : index
    %12 = vector.load %arg5[%c0_9, %c0_10, %c0_11] : memref<2x128x128xbf16, #tpu.memory_space<vmem>>, vector<1x128x128xbf16>
    %13 = vector.shape_cast %12 : vector<1x128x128xbf16> to vector<128x128xbf16>
    %cst_12 = arith.constant dense<0.000000e+00> : vector<8x128xf32>
    %14 = tpu.matmul %11, %13, %cst_12 {dimension_numbers = #tpu.dot_dimension_numbers<[1], [0], [0], [1], [0, 0, 1, 1], [], []>} : vector<8x128xbf16>, vector<128x128xbf16>, vector<8x128xf32> -> vector<8x128xf32>
    %c0_13 = arith.constant 0 : index
    %c0_14 = arith.constant 0 : index
    %c0_15 = arith.constant 0 : index
    %15 = vector.load %arg6[%c0_13, %c0_14, %c0_15] : memref<2x1x128xf32, #tpu.memory_space<vmem>>, vector<1x1x128xf32>
    %16 = vector.shape_cast %15 : vector<1x1x128xf32> to vector<1x128xf32>
    %17 = vector.broadcast %16 : vector<1x128xf32> to vector<8x128xf32>
    %18 = arith.addf %14, %17 : vector<8x128xf32>
    %19 = arith.mulf %18, %18 : vector<8x128xf32>
    %cst_16 = arith.constant dense<0.000000e+00> : vector<8xf32>
    %20 = vector.multi_reduction <add>, %19, %cst_16 [1] : vector<8x128xf32> to vector<8xf32>
    %21 = vector.shape_cast %20 : vector<8xf32> to vector<8x1xf32>
    %cst_17 = arith.constant 1.000000e-24 : f32
    %22 = vector.broadcast %cst_17 : f32 to vector<8x1xf32>
    %23 = arith.maximumf %21, %22 : vector<8x1xf32>
    %24 = math.rsqrt %23 : vector<8x1xf32>
    %25 = vector.broadcast %24 : vector<8x1xf32> to vector<8x128xf32>
    %26 = arith.mulf %18, %25 : vector<8x128xf32>
    %c0_18 = arith.constant 0 : index
    %c0_19 = arith.constant 0 : index
    %27 = memref.load %arg1[%c0_18, %c0_19] : memref<2x4xf32, #tpu.memory_space<smem>>
    %28 = vector.broadcast %27 : f32 to vector<8x128xf32>
    %29 = arith.mulf %28, %26 : vector<8x128xf32>
    %c0_20 = arith.constant 0 : index
    %c0_21 = arith.constant 0 : index
    %30 = vector.load %arg7[%c0_20, %c0_21] : memref<8x512xf32, #tpu.memory_space<vmem>>, vector<8x128xf32>
    tpu.vector_store %arg7[%c0_20, %c0_21], %29 {strides = array<i32>} : memref<8x512xf32, #tpu.memory_space<vmem>>, vector<8x128xf32>,
    %c0_22 = arith.constant 0 : index
    %c1 = arith.constant 1 : index
    %31 = memref.load %arg1[%c0_22, %c1] : memref<2x4xf32, #tpu.memory_space<smem>>
    %32 = vector.broadcast %31 : f32 to vector<8x128xf32>
    %33 = arith.mulf %32, %26 : vector<8x128xf32>
    %c0_23 = arith.constant 0 : index
    %c128 = arith.constant 128 : index
    %34 = vector.load %arg7[%c0_23, %c128] : memref<8x512xf32, #tpu.memory_space<vmem>>, vector<8x128xf32>
    tpu.vector_store %arg7[%c0_23, %c128], %33 {strides = array<i32>} : memref<8x512xf32, #tpu.memory_space<vmem>>, vector<8x128xf32>,
    %c0_24 = arith.constant 0 : index
    %c2 = arith.constant 2 : index
    %35 = memref.load %arg1[%c0_24, %c2] : memref<2x4xf32, #tpu.memory_space<smem>>
    %36 = vector.broadcast %35 : f32 to vector<8x128xf32>
    %37 = arith.mulf %36, %26 : vector<8x128xf32>
    %c0_25 = arith.constant 0 : index
    %c256 = arith.constant 256 : index
    %38 = vector.load %arg7[%c0_25, %c256] : memref<8x512xf32, #tpu.memory_space<vmem>>, vector<8x128xf32>
    tpu.vector_store %arg7[%c0_25, %c256], %37 {strides = array<i32>} : memref<8x512xf32, #tpu.memory_space<vmem>>, vector<8x128xf32>,
    %c0_26 = arith.constant 0 : index
    %c3 = arith.constant 3 : index
    %39 = memref.load %arg1[%c0_26, %c3] : memref<2x4xf32, #tpu.memory_space<smem>>
    %40 = vector.broadcast %39 : f32 to vector<8x128xf32>
    %41 = arith.mulf %40, %26 : vector<8x128xf32>
    %c0_27 = arith.constant 0 : index
    %c384 = arith.constant 384 : index
    %42 = vector.load %arg7[%c0_27, %c384] : memref<8x512xf32, #tpu.memory_space<vmem>>, vector<8x128xf32>
    tpu.vector_store %arg7[%c0_27, %c384], %41 {strides = array<i32>} : memref<8x512xf32, #tpu.memory_space<vmem>>, vector<8x128xf32>,
    %c1_28 = arith.constant 1 : index
    %c0_29 = arith.constant 0 : index
    %c0_30 = arith.constant 0 : index
    %43 = vector.load %arg2[%c1_28, %c0_29, %c0_30] : memref<2x8x32xbf16, #tpu.memory_space<vmem>>, vector<1x8x32xbf16>
    %44 = vector.shape_cast %43 : vector<1x8x32xbf16> to vector<8x32xbf16>
    %c1_31 = arith.constant 1 : index
    %c0_32 = arith.constant 0 : index
    %c0_33 = arith.constant 0 : index
    %45 = vector.load %arg3[%c1_31, %c0_32, %c0_33] : memref<2x32x128xbf16, #tpu.memory_space<vmem>>, vector<1x32x128xbf16>
    %46 = vector.shape_cast %45 : vector<1x32x128xbf16> to vector<32x128xbf16>
    %cst_34 = arith.constant dense<0.000000e+00> : vector<8x128xf32>
    %47 = tpu.matmul %44, %46, %cst_34 {dimension_numbers = #tpu.dot_dimension_numbers<[1], [0], [0], [1], [0, 0, 1, 1], [], []>} : vector<8x32xbf16>, vector<32x128xbf16>, vector<8x128xf32> -> vector<8x128xf32>
    %c1_35 = arith.constant 1 : index
    %c0_36 = arith.constant 0 : index
    %c0_37 = arith.constant 0 : index
    %48 = vector.load %arg4[%c1_35, %c0_36, %c0_37] : memref<2x1x128xf32, #tpu.memory_space<vmem>>, vector<1x1x128xf32>
    %49 = vector.shape_cast %48 : vector<1x1x128xf32> to vector<1x128xf32>
    %50 = vector.broadcast %49 : vector<1x128xf32> to vector<8x128xf32>
    %51 = arith.addf %47, %50 : vector<8x128xf32>
    %cst_38 = arith.constant 0.000000e+00 : f32
    %52 = vector.broadcast %cst_38 : f32 to vector<8x128xf32>
    %53 = arith.maximumf %51, %52 : vector<8x128xf32>
    %54 = arith.truncf %53 : vector<8x128xf32> to vector<8x128xbf16>
    %c1_39 = arith.constant 1 : index
    %c0_40 = arith.constant 0 : index
    %c0_41 = arith.constant 0 : index
    %55 = vector.load %arg5[%c1_39, %c0_40, %c0_41] : memref<2x128x128xbf16, #tpu.memory_space<vmem>>, vector<1x128x128xbf16>
    %56 = vector.shape_cast %55 : vector<1x128x128xbf16> to vector<128x128xbf16>
    %cst_42 = arith.constant dense<0.000000e+00> : vector<8x128xf32>
    %57 = tpu.matmul %54, %56, %cst_42 {dimension_numbers = #tpu.dot_dimension_numbers<[1], [0], [0], [1], [0, 0, 1, 1], [], []>} : vector<8x128xbf16>, vector<128x128xbf16>, vector<8x128xf32> -> vector<8x128xf32>
    %c1_43 = arith.constant 1 : index
    %c0_44 = arith.constant 0 : index
    %c0_45 = arith.constant 0 : index
    %58 = vector.load %arg6[%c1_43, %c0_44, %c0_45] : memref<2x1x128xf32, #tpu.memory_space<vmem>>, vector<1x1x128xf32>
    %59 = vector.shape_cast %58 : vector<1x1x128xf32> to vector<1x128xf32>
    %60 = vector.broadcast %59 : vector<1x128xf32> to vector<8x128xf32>
    %61 = arith.addf %57, %60 : vector<8x128xf32>
    %62 = arith.mulf %61, %61 : vector<8x128xf32>
    %cst_46 = arith.constant dense<0.000000e+00> : vector<8xf32>
    %63 = vector.multi_reduction <add>, %62, %cst_46 [1] : vector<8x128xf32> to vector<8xf32>
    %64 = vector.shape_cast %63 : vector<8xf32> to vector<8x1xf32>
    %cst_47 = arith.constant 1.000000e-24 : f32
    %65 = vector.broadcast %cst_47 : f32 to vector<8x1xf32>
    %66 = arith.maximumf %64, %65 : vector<8x1xf32>
    %67 = math.rsqrt %66 : vector<8x1xf32>
    %68 = vector.broadcast %67 : vector<8x1xf32> to vector<8x128xf32>
    %69 = arith.mulf %61, %68 : vector<8x128xf32>
    %c1_48 = arith.constant 1 : index
    %c0_49 = arith.constant 0 : index
    %70 = memref.load %arg1[%c1_48, %c0_49] : memref<2x4xf32, #tpu.memory_space<smem>>
    %71 = vector.broadcast %70 : f32 to vector<8x128xf32>
    %72 = arith.mulf %71, %69 : vector<8x128xf32>
    %c0_50 = arith.constant 0 : index
    %c0_51 = arith.constant 0 : index
    %73 = vector.load %arg7[%c0_50, %c0_51] : memref<8x512xf32, #tpu.memory_space<vmem>>, vector<8x128xf32>
    %74 = arith.addf %73, %72 : vector<8x128xf32>
    %c0_52 = arith.constant 0 : index
    %c0_53 = arith.constant 0 : index
    %75 = vector.load %arg7[%c0_52, %c0_53] : memref<8x512xf32, #tpu.memory_space<vmem>>, vector<8x128xf32>
    tpu.vector_store %arg7[%c0_52, %c0_53], %74 {strides = array<i32>} : memref<8x512xf32, #tpu.memory_space<vmem>>, vector<8x128xf32>,
    %c1_54 = arith.constant 1 : index
    %c1_55 = arith.constant 1 : index
    %76 = memref.load %arg1[%c1_54, %c1_55] : memref<2x4xf32, #tpu.memory_space<smem>>
    %77 = vector.broadcast %76 : f32 to vector<8x128xf32>
    %78 = arith.mulf %77, %69 : vector<8x128xf32>
    %c0_56 = arith.constant 0 : index
    %c128_57 = arith.constant 128 : index
    %79 = vector.load %arg7[%c0_56, %c128_57] : memref<8x512xf32, #tpu.memory_space<vmem>>, vector<8x128xf32>
    %80 = arith.addf %79, %78 : vector<8x128xf32>
    %c0_58 = arith.constant 0 : index
    %c128_59 = arith.constant 128 : index
    %81 = vector.load %arg7[%c0_58, %c128_59] : memref<8x512xf32, #tpu.memory_space<vmem>>, vector<8x128xf32>
    tpu.vector_store %arg7[%c0_58, %c128_59], %80 {strides = array<i32>} : memref<8x512xf32, #tpu.memory_space<vmem>>, vector<8x128xf32>,
    %c1_60 = arith.constant 1 : index
    %c2_61 = arith.constant 2 : index
    %82 = memref.load %arg1[%c1_60, %c2_61] : memref<2x4xf32, #tpu.memory_space<smem>>
    %83 = vector.broadcast %82 : f32 to vector<8x128xf32>
    %84 = arith.mulf %83, %69 : vector<8x128xf32>
    %c0_62 = arith.constant 0 : index
    %c256_63 = arith.constant 256 : index
    %85 = vector.load %arg7[%c0_62, %c256_63] : memref<8x512xf32, #tpu.memory_space<vmem>>, vector<8x128xf32>
    %86 = arith.addf %85, %84 : vector<8x128xf32>
    %c0_64 = arith.constant 0 : index
    %c256_65 = arith.constant 256 : index
    %87 = vector.load %arg7[%c0_64, %c256_65] : memref<8x512xf32, #tpu.memory_space<vmem>>, vector<8x128xf32>
    tpu.vector_store %arg7[%c0_64, %c256_65], %86 {strides = array<i32>} : memref<8x512xf32, #tpu.memory_space<vmem>>, vector<8x128xf32>,
    %c1_66 = arith.constant 1 : index
    %c3_67 = arith.constant 3 : index
    %88 = memref.load %arg1[%c1_66, %c3_67] : memref<2x4xf32, #tpu.memory_space<smem>>
    %89 = vector.broadcast %88 : f32 to vector<8x128xf32>
    %90 = arith.mulf %89, %69 : vector<8x128xf32>
    %c0_68 = arith.constant 0 : index
    %c384_69 = arith.constant 384 : index
    %91 = vector.load %arg7[%c0_68, %c384_69] : memref<8x512xf32, #tpu.memory_space<vmem>>, vector<8x128xf32>
    %92 = arith.addf %91, %90 : vector<8x128xf32>
    %c0_70 = arith.constant 0 : index
    %c384_71 = arith.constant 384 : index
    %93 = vector.load %arg7[%c0_70, %c384_71] : memref<8x512xf32, #tpu.memory_space<vmem>>, vector<8x128xf32>
    tpu.vector_store %arg7[%c0_70, %c384_71], %92 {strides = array<i32>} : memref<8x512xf32, #tpu.memory_space<vmem>>, vector<8x128xf32>,
    return
  }
  func.func @transform_0(%arg0: i32) -> (i32, i32) {
    %c0_i32 = arith.constant 0 : i32
    %c0_i32_0 = arith.constant 0 : i32
    %c0_i32_1 = arith.constant 0 : i32
    return %c0_i32, %c0_i32_0 : i32, i32
  }
  func.func @transform_1(%arg0: i32) -> (i32, i32, i32) {
    %c0_i32 = arith.constant 0 : i32
    %c0_i32_0 = arith.constant 0 : i32
    %c0_i32_1 = arith.constant 0 : i32
    return %c0_i32, %arg0, %c0_i32_0 : i32, i32, i32
  }
  func.func @transform_2(%arg0: i32) -> (i32, i32, i32) {
    %c0_i32 = arith.constant 0 : i32
    %c0_i32_0 = arith.constant 0 : i32
    %c0_i32_1 = arith.constant 0 : i32
    %c0_i32_2 = arith.constant 0 : i32
    return %c0_i32, %c0_i32_0, %c0_i32_1 : i32, i32, i32
  }
  func.func @transform_3(%arg0: i32) -> (i32, i32, i32) {
    %c0_i32 = arith.constant 0 : i32
    %c0_i32_0 = arith.constant 0 : i32
    %c0_i32_1 = arith.constant 0 : i32
    %c0_i32_2 = arith.constant 0 : i32
    return %c0_i32, %c0_i32_0, %c0_i32_1 : i32, i32, i32
  }
  func.func @transform_4(%arg0: i32) -> (i32, i32, i32) {
    %c0_i32 = arith.constant 0 : i32
    %c0_i32_0 = arith.constant 0 : i32
    %c0_i32_1 = arith.constant 0 : i32
    %c0_i32_2 = arith.constant 0 : i32
    return %c0_i32, %c0_i32_0, %c0_i32_1 : i32, i32, i32
  }
  func.func @transform_5(%arg0: i32) -> (i32, i32, i32) {
    %c0_i32 = arith.constant 0 : i32
    %c0_i32_0 = arith.constant 0 : i32
    %c0_i32_1 = arith.constant 0 : i32
    %c0_i32_2 = arith.constant 0 : i32
    return %c0_i32, %c0_i32_0, %c0_i32_1 : i32, i32, i32
  }
  func.func @transform_6(%arg0: i32) -> (i32, i32) {
    %c0_i32 = arith.constant 0 : i32
    %c0_i32_0 = arith.constant 0 : i32
    return %arg0, %c0_i32 : i32, i32
  }
}

module attributes {stable_mosaic.version = 11 : i64} {
  func.func @cosmo_kernel(%arg0: i32, %arg1: memref<2x4xf32, #tpu.memory_space<smem>>, %arg2: memref<2x8x32xbf16, #tpu.memory_space<vmem>>, %arg3: memref<2x32x128xbf16, #tpu.memory_space<vmem>>, %arg4: memref<2x1x128xf32, #tpu.memory_space<vmem>>, %arg5: memref<2x128x128xbf16, #tpu.memory_space<vmem>>, %arg6: memref<2x1x128xf32, #tpu.memory_space<vmem>>, %arg7: memref<8x512xf32, #tpu.memory_space<vmem>>) attributes {dimension_semantics = [#tpu.dimension_semantics<parallel>], iteration_bounds = array<i64: 1>, scalar_prefetch = 0 : i64, scratch_operands = 0 : i64, tpu.core_type = #tpu.core_type<tc>, window_params = [{transform_indices = @transform_0, window_bounds = array<i64: 2, 4>}, {transform_indices = @transform_1, window_bounds = array<i64: 2, 8, 32>}, {pipeline_mode = #tpu.pipeline_mode<synchronous>, transform_indices = @transform_2, window_bounds = array<i64: 2, 32, 128>}, {pipeline_mode = #tpu.pipeline_mode<synchronous>, transform_indices = @transform_3, window_bounds = array<i64: 2, 1, 128>}, {pipeline_mode = #tpu.pipeline_mode<synchronous>, transform_indices = @transform_4, window_bounds = array<i64: 2, 128, 128>}, {pipeline_mode = #tpu.pipeline_mode<synchronous>, transform_indices = @transform_5, window_bounds = array<i64: 2, 1, 128>}, {transform_indices = @transform_6, window_bounds = array<i64: 8, 512>}]} {
    %c0 = arith.constant 0 : index
    %c0_0 = arith.constant 0 : index
    %c0_1 = arith.constant 0 : index
    %0 = vector.load %arg2[%c0, %c0_0, %c0_1] : memref<2x8x32xbf16, #tpu.memory_space<vmem>>, vector<1x8x32xbf16>
    %1 = vector.shape_cast %0 : vector<1x8x32xbf16> to vector<8x32xbf16>
    %c0_2 = arith.constant 0 : index
    %c0_3 = arith.constant 0 : index
    %c0_4 = arith.constant 0 : index
    %2 = vector.load %arg3[%c0_2, %c0_3, %c0_4] : memref<2x32x128xbf16, #tpu.memory_space<vmem>>, vector<1x32x128xbf16>
    %3 = vector.shape_cast %2 : vector<1x32x128xbf16> to vector<32x128xbf16>
    %cst = arith.constant dense<0.000000e+00> : vector<8x128xf32>
    %4 = tpu.matmul %1, %3, %cst {dimension_numbers = #tpu.dot_dimension_numbers<[1], [0], [0], [1], [0, 0, 1, 1], [], []>} : vector<8x32xbf16>, vector<32x128xbf16>, vector<8x128xf32> -> vector<8x128xf32>
    %c0_5 = arith.constant 0 : index
    %c0_6 = arith.constant 0 : index
    %c0_7 = arith.constant 0 : index
    %5 = vector.load %arg4[%c0_5, %c0_6, %c0_7] : memref<2x1x128xf32, #tpu.memory_space<vmem>>, vector<1x1x128xf32>
    %6 = vector.shape_cast %5 : vector<1x1x128xf32> to vector<1x128xf32>
    %7 = vector.broadcast %6 : vector<1x128xf32> to vector<8x128xf32>
    %8 = arith.addf %4, %7 : vector<8x128xf32>
    %cst_8 = arith.constant 0.000000e+00 : f32
    %9 = vector.broadcast %cst_8 : f32 to vector<8x128xf32>
    %10 = arith.maximumf %8, %9 : vector<8x128xf32>
    %11 = arith.truncf %10 : vector<8x128xf32> to vector<8x128xbf16>
    %c0_9 = arith.constant 0 : index
    %c0_10 = arith.constant 0 : index
    %c0_11 = arith.constant 0 : index
    %12 = vector.load %arg5[%c0_9, %c0_10, %c0_11] : memref<2x128x128xbf16, #tpu.memory_space<vmem>>, vector<1x128x128xbf16>
    %13 = vector.shape_cast %12 : vector<1x128x128xbf16> to vector<128x128xbf16>
    %cst_12 = arith.constant dense<0.000000e+00> : vector<8x128xf32>
    %14 = tpu.matmul %11, %13, %cst_12 {dimension_numbers = #tpu.dot_dimension_numbers<[1], [0], [0], [1], [0, 0, 1, 1], [], []>} : vector<8x128xbf16>, vector<128x128xbf16>, vector<8x128xf32> -> vector<8x128xf32>
    %c0_13 = arith.constant 0 : index
    %c0_14 = arith.constant 0 : index
    %c0_15 = arith.constant 0 : index
    %15 = vector.load %arg6[%c0_13, %c0_14, %c0_15] : memref<2x1x128xf32, #tpu.memory_space<vmem>>, vector<1x1x128xf32>
    %16 = vector.shape_cast %15 : vector<1x1x128xf32> to vector<1x128xf32>
    %17 = vector.broadcast %16 : vector<1x128xf32> to vector<8x128xf32>
    %18 = arith.addf %14, %17 : vector<8x128xf32>
    %19 = arith.mulf %18, %18 : vector<8x128xf32>
    %cst_16 = arith.constant dense<0.000000e+00> : vector<8xf32>
    %20 = vector.multi_reduction <add>, %19, %cst_16 [1] : vector<8x128xf32> to vector<8xf32>
    %21 = vector.shape_cast %20 : vector<8xf32> to vector<8x1xf32>
    %cst_17 = arith.constant 1.000000e-24 : f32
    %22 = vector.broadcast %cst_17 : f32 to vector<8x1xf32>
    %23 = arith.maximumf %21, %22 : vector<8x1xf32>
    %24 = math.rsqrt %23 : vector<8x1xf32>
    %25 = vector.broadcast %24 : vector<8x1xf32> to vector<8x128xf32>
    %26 = arith.mulf %18, %25 : vector<8x128xf32>
    %c0_18 = arith.constant 0 : index
    %c0_19 = arith.constant 0 : index
    %27 = memref.load %arg1[%c0_18, %c0_19] : memref<2x4xf32, #tpu.memory_space<smem>>
    %28 = vector.broadcast %27 : f32 to vector<8x128xf32>
    %29 = arith.mulf %28, %26 : vector<8x128xf32>
    %c0_20 = arith.constant 0 : index
    %c0_21 = arith.constant 0 : index
    %30 = vector.load %arg7[%c0_20, %c0_21] : memref<8x512xf32, #tpu.memory_space<vmem>>, vector<8x128xf32>
    tpu.vector_store %arg7[%c0_20, %c0_21], %29 {strides = array<i32>} : memref<8x512xf32, #tpu.memory_space<vmem>>, vector<8x128xf32>,
    %c0_22 = arith.constant 0 : index
    %c1 = arith.constant 1 : index
    %31 = memref.load %arg1[%c0_22, %c1] : memref<2x4xf32, #tpu.memory_space<smem>>
    %32 = vector.broadcast %31 : f32 to vector<8x128xf32>
    %33 = arith.mulf %32, %26 : vector<8x128xf32>
    %c0_23 = arith.constant 0 : index
    %c128 = arith.constant 128 : index
    %34 = vector.load %arg7[%c0_23, %c128] : memref<8x512xf32, #tpu.memory_space<vmem>>, vector<8x128xf32>
    tpu.vector_store %arg7[%c0_23, %c128], %33 {strides = array<i32>} : memref<8x512xf32, #tpu.memory_space<vmem>>, vector<8x128xf32>,
    %c0_24 = arith.constant 0 : index
    %c2 = arith.constant 2 : index
    %35 = memref.load %arg1[%c0_24, %c2] : memref<2x4xf32, #tpu.memory_space<smem>>
    %36 = vector.broadcast %35 : f32 to vector<8x128xf32>
    %37 = arith.mulf %36, %26 : vector<8x128xf32>
    %c0_25 = arith.constant 0 : index
    %c256 = arith.constant 256 : index
    %38 = vector.load %arg7[%c0_25, %c256] : memref<8x512xf32, #tpu.memory_space<vmem>>, vector<8x128xf32>
    tpu.vector_store %arg7[%c0_25, %c256], %37 {strides = array<i32>} : memref<8x512xf32, #tpu.memory_space<vmem>>, vector<8x128xf32>,
    %c0_26 = arith.constant 0 : index
    %c3 = arith.constant 3 : index
    %39 = memref.load %arg1[%c0_26, %c3] : memref<2x4xf32, #tpu.memory_space<smem>>
    %40 = vector.broadcast %39 : f32 to vector<8x128xf32>
    %41 = arith.mulf %40, %26 : vector<8x128xf32>
    %c0_27 = arith.constant 0 : index
    %c384 = arith.constant 384 : index
    %42 = vector.load %arg7[%c0_27, %c384] : memref<8x512xf32, #tpu.memory_space<vmem>>, vector<8x128xf32>
    tpu.vector_store %arg7[%c0_27, %c384], %41 {strides = array<i32>} : memref<8x512xf32, #tpu.memory_space<vmem>>, vector<8x128xf32>,
    %c1_28 = arith.constant 1 : index
    %c0_29 = arith.constant 0 : index
    %c0_30 = arith.constant 0 : index
    %43 = vector.load %arg2[%c1_28, %c0_29, %c0_30] : memref<2x8x32xbf16, #tpu.memory_space<vmem>>, vector<1x8x32xbf16>
    %44 = vector.shape_cast %43 : vector<1x8x32xbf16> to vector<8x32xbf16>
    %c1_31 = arith.constant 1 : index
    %c0_32 = arith.constant 0 : index
    %c0_33 = arith.constant 0 : index
    %45 = vector.load %arg3[%c1_31, %c0_32, %c0_33] : memref<2x32x128xbf16, #tpu.memory_space<vmem>>, vector<1x32x128xbf16>
    %46 = vector.shape_cast %45 : vector<1x32x128xbf16> to vector<32x128xbf16>
    %cst_34 = arith.constant dense<0.000000e+00> : vector<8x128xf32>
    %47 = tpu.matmul %44, %46, %cst_34 {dimension_numbers = #tpu.dot_dimension_numbers<[1], [0], [0], [1], [0, 0, 1, 1], [], []>} : vector<8x32xbf16>, vector<32x128xbf16>, vector<8x128xf32> -> vector<8x128xf32>
    %c1_35 = arith.constant 1 : index
    %c0_36 = arith.constant 0 : index
    %c0_37 = arith.constant 0 : index
    %48 = vector.load %arg4[%c1_35, %c0_36, %c0_37] : memref<2x1x128xf32, #tpu.memory_space<vmem>>, vector<1x1x128xf32>
    %49 = vector.shape_cast %48 : vector<1x1x128xf32> to vector<1x128xf32>
    %50 = vector.broadcast %49 : vector<1x128xf32> to vector<8x128xf32>
    %51 = arith.addf %47, %50 : vector<8x128xf32>
    %cst_38 = arith.constant 0.000000e+00 : f32
    %52 = vector.broadcast %cst_38 : f32 to vector<8x128xf32>
    %53 = arith.maximumf %51, %52 : vector<8x128xf32>
    %54 = arith.truncf %53 : vector<8x128xf32> to vector<8x128xbf16>
    %c1_39 = arith.constant 1 : index
    %c0_40 = arith.constant 0 : index
    %c0_41 = arith.constant 0 : index
    %55 = vector.load %arg5[%c1_39, %c0_40, %c0_41] : memref<2x128x128xbf16, #tpu.memory_space<vmem>>, vector<1x128x128xbf16>
    %56 = vector.shape_cast %55 : vector<1x128x128xbf16> to vector<128x128xbf16>
    %cst_42 = arith.constant dense<0.000000e+00> : vector<8x128xf32>
    %57 = tpu.matmul %54, %56, %cst_42 {dimension_numbers = #tpu.dot_dimension_numbers<[1], [0], [0], [1], [0, 0, 1, 1], [], []>} : vector<8x128xbf16>, vector<128x128xbf16>, vector<8x128xf32> -> vector<8x128xf32>
    %c1_43 = arith.constant 1 : index
    %c0_44 = arith.constant 0 : index
    %c0_45 = arith.constant 0 : index
    %58 = vector.load %arg6[%c1_43, %c0_44, %c0_45] : memref<2x1x128xf32, #tpu.memory_space<vmem>>, vector<1x1x128xf32>
    %59 = vector.shape_cast %58 : vector<1x1x128xf32> to vector<1x128xf32>
    %60 = vector.broadcast %59 : vector<1x128xf32> to vector<8x128xf32>
    %61 = arith.addf %57, %60 : vector<8x128xf32>
    %62 = arith.mulf %61, %61 : vector<8x128xf32>
    %cst_46 = arith.constant dense<0.000000e+00> : vector<8xf32>
    %63 = vector.multi_reduction <add>, %62, %cst_46 [1] : vector<8x128xf32> to vector<8xf32>
    %64 = vector.shape_cast %63 : vector<8xf32> to vector<8x1xf32>
    %cst_47 = arith.constant 1.000000e-24 : f32
    %65 = vector.broadcast %cst_47 : f32 to vector<8x1xf32>
    %66 = arith.maximumf %64, %65 : vector<8x1xf32>
    %67 = math.rsqrt %66 : vector<8x1xf32>
    %68 = vector.broadcast %67 : vector<8x1xf32> to vector<8x128xf32>
    %69 = arith.mulf %61, %68 : vector<8x128xf32>
    %c1_48 = arith.constant 1 : index
    %c0_49 = arith.constant 0 : index
    %70 = memref.load %arg1[%c1_48, %c0_49] : memref<2x4xf32, #tpu.memory_space<smem>>
    %71 = vector.broadcast %70 : f32 to vector<8x128xf32>
    %72 = arith.mulf %71, %69 : vector<8x128xf32>
    %c0_50 = arith.constant 0 : index
    %c0_51 = arith.constant 0 : index
    %73 = vector.load %arg7[%c0_50, %c0_51] : memref<8x512xf32, #tpu.memory_space<vmem>>, vector<8x128xf32>
    %74 = arith.addf %73, %72 : vector<8x128xf32>
    %c0_52 = arith.constant 0 : index
    %c0_53 = arith.constant 0 : index
    %75 = vector.load %arg7[%c0_52, %c0_53] : memref<8x512xf32, #tpu.memory_space<vmem>>, vector<8x128xf32>
    tpu.vector_store %arg7[%c0_52, %c0_53], %74 {strides = array<i32>} : memref<8x512xf32, #tpu.memory_space<vmem>>, vector<8x128xf32>,
    %c1_54 = arith.constant 1 : index
    %c1_55 = arith.constant 1 : index
    %76 = memref.load %arg1[%c1_54, %c1_55] : memref<2x4xf32, #tpu.memory_space<smem>>
    %77 = vector.broadcast %76 : f32 to vector<8x128xf32>
    %78 = arith.mulf %77, %69 : vector<8x128xf32>
    %c0_56 = arith.constant 0 : index
    %c128_57 = arith.constant 128 : index
    %79 = vector.load %arg7[%c0_56, %c128_57] : memref<8x512xf32, #tpu.memory_space<vmem>>, vector<8x128xf32>
    %80 = arith.addf %79, %78 : vector<8x128xf32>
    %c0_58 = arith.constant 0 : index
    %c128_59 = arith.constant 128 : index
    %81 = vector.load %arg7[%c0_58, %c128_59] : memref<8x512xf32, #tpu.memory_space<vmem>>, vector<8x128xf32>
    tpu.vector_store %arg7[%c0_58, %c128_59], %80 {strides = array<i32>} : memref<8x512xf32, #tpu.memory_space<vmem>>, vector<8x128xf32>,
    %c1_60 = arith.constant 1 : index
    %c2_61 = arith.constant 2 : index
    %82 = memref.load %arg1[%c1_60, %c2_61] : memref<2x4xf32, #tpu.memory_space<smem>>
    %83 = vector.broadcast %82 : f32 to vector<8x128xf32>
    %84 = arith.mulf %83, %69 : vector<8x128xf32>
    %c0_62 = arith.constant 0 : index
    %c256_63 = arith.constant 256 : index
    %85 = vector.load %arg7[%c0_62, %c256_63] : memref<8x512xf32, #tpu.memory_space<vmem>>, vector<8x128xf32>
    %86 = arith.addf %85, %84 : vector<8x128xf32>
    %c0_64 = arith.constant 0 : index
    %c256_65 = arith.constant 256 : index
    %87 = vector.load %arg7[%c0_64, %c256_65] : memref<8x512xf32, #tpu.memory_space<vmem>>, vector<8x128xf32>
    tpu.vector_store %arg7[%c0_64, %c256_65], %86 {strides = array<i32>} : memref<8x512xf32, #tpu.memory_space<vmem>>, vector<8x128xf32>,
    %c1_66 = arith.constant 1 : index
    %c3_67 = arith.constant 3 : index
    %88 = memref.load %arg1[%c1_66, %c3_67] : memref<2x4xf32, #tpu.memory_space<smem>>
    %89 = vector.broadcast %88 : f32 to vector<8x128xf32>
    %90 = arith.mulf %89, %69 : vector<8x128xf32>
    %c0_68 = arith.constant 0 : index
    %c384_69 = arith.constant 384 : index
    %91 = vector.load %arg7[%c0_68, %c384_69] : memref<8x512xf32, #tpu.memory_space<vmem>>, vector<8x128xf32>
    %92 = arith.addf %91, %90 : vector<8x128xf32>
    %c0_70 = arith.constant 0 : index
    %c384_71 = arith.constant 384 : index
    %93 = vector.load %arg7[%c0_70, %c384_71] : memref<8x512xf32, #tpu.memory_space<vmem>>, vector<8x128xf32>
    tpu.vector_store %arg7[%c0_70, %c384_71], %92 {strides = array<i32>} : memref<8x512xf32, #tpu.memory_space<vmem>>, vector<8x128xf32>,
    return
  }
  func.func @transform_0(%arg0: i32) -> (i32, i32) {
    %c0_i32 = arith.constant 0 : i32
    %c0_i32_0 = arith.constant 0 : i32
    %c0_i32_1 = arith.constant 0 : i32
    return %c0_i32, %c0_i32_0 : i32, i32
  }
  func.func @transform_1(%arg0: i32) -> (i32, i32, i32) {
    %c0_i32 = arith.constant 0 : i32
    %c0_i32_0 = arith.constant 0 : i32
    %c0_i32_1 = arith.constant 0 : i32
    return %c0_i32, %arg0, %c0_i32_0 : i32, i32, i32
  }
  func.func @transform_2(%arg0: i32) -> (i32, i32, i32) {
    %c0_i32 = arith.constant 0 : i32
    %c0_i32_0 = arith.constant 0 : i32
    %c0_i32_1 = arith.constant 0 : i32
    %c0_i32_2 = arith.constant 0 : i32
    return %c0_i32, %c0_i32_0, %c0_i32_1 : i32, i32, i32
  }
  func.func @transform_3(%arg0: i32) -> (i32, i32, i32) {
    %c0_i32 = arith.constant 0 : i32
    %c0_i32_0 = arith.constant 0 : i32
    %c0_i32_1 = arith.constant 0 : i32
    %c0_i32_2 = arith.constant 0 : i32
    return %c0_i32, %c0_i32_0, %c0_i32_1 : i32, i32, i32
  }
  func.func @transform_4(%arg0: i32) -> (i32, i32, i32) {
    %c0_i32 = arith.constant 0 : i32
    %c0_i32_0 = arith.constant 0 : i32
    %c0_i32_1 = arith.constant 0 : i32
    %c0_i32_2 = arith.constant 0 : i32
    return %c0_i32, %c0_i32_0, %c0_i32_1 : i32, i32, i32
  }
  func.func @transform_5(%arg0: i32) -> (i32, i32, i32) {
    %c0_i32 = arith.constant 0 : i32
    %c0_i32_0 = arith.constant 0 : i32
    %c0_i32_1 = arith.constant 0 : i32
    %c0_i32_2 = arith.constant 0 : i32
    return %c0_i32, %c0_i32_0, %c0_i32_1 : i32, i32, i32
  }
  func.func @transform_6(%arg0: i32) -> (i32, i32) {
    %c0_i32 = arith.constant 0 : i32
    %c0_i32_0 = arith.constant 0 : i32
    return %arg0, %c0_i32 : i32, i32
  }
}

</mosaic_0001>

<bundles_post_ra>
// kernel: tpu_custom_call.1
= control target key start
LH: loop header
LB: loop body
LE: loop exit
PB: predicated region body
PF: predicated region fallthrough
CT: control target
= control target key end

     0   :  { %11 = vsyncpa [#allocation5], 0  ;;  %s919_s0 = inlined_call_operand.hbm [shape: f32[2,4], index: 0, kind: input, shape index: {}]   ;;  %s920_s1 = inlined_call_operand.hbm [shape: bf16[2,8,32], index: 1, kind: input, shape index: {}]   ;;  %s921_s2 = inlined_call_operand.hbm [shape: bf16[2,32,128], index: 2, kind: input, shape index: {}]   ;;  %s922_s3 = inlined_call_operand.vmem [shape: f32[2,1,128], index: 3, kind: input, shape index: {}]   ;;  %s923_s4 = inlined_call_operand.hbm [shape: bf16[2,128,128], index: 4, kind: input, shape index: {}]   ;;  %s924_s5 = inlined_call_operand.vmem [shape: f32[2,1,128], index: 5, kind: input, shape index: {}]   ;;  %s925_s6 = inlined_call_operand.hbm [shape: f32[8,512], index: 6, kind: output, shape index: {}]  }
   0x1   :  { %12 = vsyncpa [#allocation3], 0 }
   0x2   :  { %13 = vsyncpa [#allocation8], 0 }
   0x3   :  { %14 = vsyncpa [#allocation4], 0  ;;  %s766_s21 = smov [#allocation7]   ;;  %s767_s23 = smov [#allocation6]  }
   0x4   :  { %s40_s22 = sshll.u32 %s766_s21, 4  ;;  %s28_s24 = sshll.u32 %s767_s23, 4  ;;  %s41_s22 = int_to_ptr.vmem [resolvable:$true] %s40_s22  ;;  %s29_s24 = int_to_ptr.vmem [resolvable:$true] %s28_s24 }
   0x5   :  { %s660_s27 = scalar_lea.hbm %s921_s2, 512 }
   0x6   :  { %p661_p0 = scmp.ne.s32.totalorder %s921_s2, %s660_s27  ;;  %p664_p1 = scmp.lt.u32.totalorder %s660_s27, %s921_s2 }
   0x8   :  { %p666_p2 = pnand %p664_p1, %p661_p0 }
   0xa   :  { %669 = shalt.err (!%p666_p2)
}
   0xb   :  { %s670_s8 = scalar_lea.vmem %s41_s22, 512  ;;  %p675_p4 = scmp.lt.s32.totalorder %s41_s22, %s41_s22 }
   0xc   :  { %p671_p3 = scmp.ne.s32.totalorder %s41_s22, %s670_s8  ;;  %p676_p5 = scmp.lt.s32.totalorder %s670_s8, %s670_s8 }
   0xe   :  { %p677_p6 = por %p676_p5, %p675_p4 }
  0x10   :  { %p678_p7 = pnand %p677_p6, %p671_p3 }
  0x12   :  { %681 = shalt.err (!%p678_p7)
}
  0x13   :  { %s768_s9 = smov 64   ;;  %s769_s10 = smov 4  }
  0x14   :  { %46 = dma.hbm_to_vmem [thread:$0]  %s921_s2, 512, %s41_s22, [#allocation8], %s768_s9, %s768_s9, %s769_s10  }
  0x15   :  { %s682_s15 = scalar_lea.hbm %s919_s0, 32 }
  0x16   :  { %p683_p8 = scmp.ne.s32.totalorder %s919_s0, %s682_s15  ;;  %p686_p9 = scmp.lt.u32.totalorder %s682_s15, %s919_s0 }
  0x18   :  { %p688_p10 = pnand %p686_p9, %p683_p8 }
  0x1a   :  { %691 = shalt.err (!%p688_p10)
}
  0x1b   :  { %s770_s20 = smov [#allocation2]   ;;  %s692_s25 = scalar_lea.hbm %s920_s1, 128 }
  0x1c   :  { %22 = dma.hbm_to_smem %s919_s0, 32, %s770_s20, [#allocation5]  }
  0x1d   :  { %p693_p11 = scmp.ne.s32.totalorder %s920_s1, %s692_s25  ;;  %p696_p12 = scmp.lt.u32.totalorder %s692_s25, %s920_s1 }
  0x1f   :  { %p698_p13 = pnand %p696_p12, %p693_p11 }
  0x21   :  { %701 = shalt.err (!%p698_p13)
}
  0x22   :  { %s702_s30 = scalar_lea.vmem %s29_s24, 128  ;;  %p707_p1 = scmp.lt.s32.totalorder %s29_s24, %s29_s24 }
  0x23   :  { %p703_p0 = scmp.ne.s32.totalorder %s29_s24, %s702_s30  ;;  %p708_p2 = scmp.lt.s32.totalorder %s702_s30, %s702_s30 }
  0x25   :  { %p709_p3 = por %p708_p2, %p707_p1 }
  0x27   :  { %p710_p4 = pnand %p709_p3, %p703_p0 }
  0x29   :  { %713 = shalt.err (!%p710_p4)
}
  0x2a   :  { %34 = dma.hbm_to_vmem [thread:$0]  %s920_s1, 128, %s29_s24, [#allocation3], %s768_s9, %s768_s9, %s769_s10  }
  0x2b   :  { %s771_s8 = smov [#allocation9]   ;;  %s714_s14 = scalar_lea.hbm %s923_s4, 2048 }
  0x2c   :  { %s54_s11 = sshll.u32 %s771_s8, 4  ;;  %p715_p5 = scmp.ne.s32.totalorder %s923_s4, %s714_s14  ;;  %s55_s11 = int_to_ptr.vmem [resolvable:$true] %s54_s11 }
  0x2d   :  { %p718_p6 = scmp.lt.u32.totalorder %s714_s14, %s923_s4 }
  0x2f   :  { %p720_p7 = pnand %p718_p6, %p715_p5 }
  0x31   :  { %723 = shalt.err (!%p720_p7)
}
  0x32   :  { %s724_s19 = scalar_lea.vmem %s55_s11, 2048  ;;  %p729_p9 = scmp.lt.s32.totalorder %s55_s11, %s55_s11 }
  0x33   :  { %p725_p8 = scmp.ne.s32.totalorder %s55_s11, %s724_s19  ;;  %p730_p10 = scmp.lt.s32.totalorder %s724_s19, %s724_s19 }
  0x35   :  { %p731_p11 = por %p730_p10, %p729_p9 }
  0x37   :  { %p732_p12 = pnand %p731_p11, %p725_p8 }
  0x39   :  { %735 = shalt.err (!%p732_p12)
}
  0x3a   :  { %60 = dma.hbm_to_vmem [thread:$0]  %s923_s4, 2048, %s55_s11, [#allocation8], %s768_s9, %s768_s9, %s769_s10  }
  0x3b   :  { %758 = dma.done.wait [#allocation5], 32  }
  0x3c   :  { %759 = vsyncadd [#allocation5], 4294967264 }
  0x3d   :  { %760 = dma.done.wait [#allocation3], 128  }
  0x3e   :  { %761 = vsyncadd [#allocation3], 4294967168 }
  0x3f   :  { %762 = dma.done.wait [#allocation8], 2560  }
  0x40   :  { %763 = vsyncadd [#allocation8], 4294964736 }
  0x41   :  { %75 = sfence }
  0x42   :  { %v636_v0 = vld [vmem:[#allocation7] sm:$0xff]   ;;  %v772_v1 = vmov 0.0   ;;  %v637_v2 = vld [vmem:[#allocation7 + $0x8] sm:$0xff]   ;;  %v638_v3 = vld [vmem:[#allocation7 + $0x10] sm:$0xff]   ;;  %vm773_vm0 = vmmov 0   ;;  %vm101_vm1 = vcmask 261120  }
  0x43   :  { %571 = vmatprep.subr.bf16.mxu1 %v772_v1  ;;  %599 = vmatprep.subr.bf16.mxu0 %v772_v1  ;;  %v639_v4 = vld [vmem:[#allocation7 + $0x18] sm:$0xff]   ;;  %v640_v6 = vld [vmem:[#allocation9] sm:$0xff]   ;;  %v641_v9 = vld [vmem:[#allocation9 + $0x8] sm:$0xff]   ;;  %s264_s22 = sld [smem:[#allocation2]]  ;;  %s526_s25 = sld [smem:[#allocation2 + $0x2]] }
  0x44   :  { %572 = vmatpush3.bf16.msra.mxu1 %v636_v0  ;;  %575 = vmatprep.mubr.msk.bf16.mxu1 %vm773_vm0, %v772_v1  ;;  %v77_v5 = vld [vmem:[#allocation6] sm:$0xf]  ;;  %v281_v7 = vld [vmem:[#allocation6 + $0x4] sm:$0xf]  ;;  %v642_v8 = vld [vmem:[#allocation9 + $0x40] sm:$0xff]   ;;  %s527_s26 = sld [smem:[#allocation2 + $0x3]] }
  0x45   :  { %573 = vmatprep.subr.bf16.mxu1 %v772_v1  ;;  %603 = vmatprep.mubr.msk.bf16.mxu0 %vm773_vm0, %v772_v1  ;;  %v644_v10 = vld [vmem:[#allocation9 + $0x48] sm:$0xff]   ;;  %v643_v11 = vld [vmem:[#allocation9 + $0x10] sm:$0xff]   ;;  %v645_v13 = vld [vmem:[#allocation9 + $0x18] sm:$0xff]   ;;  %s543_s27 = sld [smem:[#allocation2 + $0x80]]  ;;  %s544_s28 = sld [smem:[#allocation2 + $0x81]] }
  0x46   :  { %600 = vmatpush3.bf16.msra.mxu0 %v638_v3  ;;  %v646_v12 = vld [vmem:[#allocation9 + $0x50] sm:$0xff]   ;;  %v648_v14 = vld [vmem:[#allocation9 + $0x58] sm:$0xff]   ;;  %v647_v15 = vld [vmem:[#allocation9 + $0x20] sm:$0xff]   ;;  %s545_s29 = sld [smem:[#allocation2 + $0x82]]  ;;  %s546_s30 = sld [smem:[#allocation2 + $0x83]] }
  0x47   :  { %601 = vmatprep.subr.bf16.mxu0 %v772_v1  ;;  %v650_v16 = vld [vmem:[#allocation9 + $0x60] sm:$0xff]   ;;  %v649_v17 = vld [vmem:[#allocation9 + $0x28] sm:$0xff]   ;;  %v651_v19 = vld [vmem:[#allocation9 + $0x30] sm:$0xff]   ;;  %s774_s0 = smov [#allocation10]  }
  0x48   :  { %574 = vmatpush3.bf16.msra.mxu1 %v637_v2  ;;  %v652_v18 = vld [vmem:[#allocation9 + $0x68] sm:$0xff]   ;;  %v654_v20 = vld [vmem:[#allocation9 + $0x70] sm:$0xff]   ;;  %v653_v21 = vld [vmem:[#allocation9 + $0x38] sm:$0xff]   ;;  %s501_s7 = sshll.u32 %s774_s0, 4  ;;  %s502_s7 = int_to_ptr.vmem [resolvable:$true] %s501_s7 }
  0x49   :  { %579 = vmatprep.subr.bf16.mxu1 %v772_v1  ;;  %v655_v22 = vld [vmem:[#allocation9 + $0x78] sm:$0xff]   ;;  %v265_v59 = vstv %s264_s22  ;;  %v273_v61 = vstv %s526_s25  ;;  %s736_s8 = scalar_lea.vmem %s502_s7, 512  ;;  %p741_p0 = scmp.lt.s32.totalorder %s502_s7, %s502_s7 }
  0x4a   :  { %602 = vmatpush3.bf16.msra.mxu0 %v639_v4  ;;  %v512_v23 = vld [vmem:[%s922_s3] ss:$0 sm:$0xff]  ;;  %v529_v25 = vld [vmem:[%s922_s3 + $0x1] ss:$0 sm:$0xff]  ;;  %v277_v62 = vstv %s527_s26  ;;  %p737_p13 = scmp.ne.s32.totalorder %s502_s7, %s736_s8  ;;  %p742_p1 = scmp.lt.s32.totalorder %s736_s8, %s736_s8 }
  0x4b   :  { %576 = vmatmul.mubr.msk.bf16.vlgmr.msra.gmra.mrb[0].mxu1 %vm101_vm1, %v77_v5  ;;  %607 = vmatprep.subr.bf16.mxu0 %v772_v1  ;;  %v516_v39 = vld [vmem:[%s924_s5] ss:$0 sm:$0xff]  ;;  %v534_v41 = vld [vmem:[%s924_s5 + $0x1] ss:$0 sm:$0xff]  ;;  %s525_s5 = sld [smem:[#allocation2 + $0x1]]  ;;  %v472_v0 = vstv %s543_s27 }
  0x4c   :  { %580 = vmatpush3.bf16.msra.mxu1 %v640_v6  ;;  %595 = vmatprep.mubr.msk.bf16.mxu1 %vm773_vm0, %v772_v1  ;;  %v484_v2 = vstv %s545_s29  ;;  %v490_v3 = vstv %s546_s30  ;;  %p743_p2 = por %p742_p1, %p741_p0 }
  0x4d   :  { %604 = vmatmul.mubr.msk.bf16.vlgmr.msra.gmra.mrb[0].mxu0 %vm101_vm1, %v281_v7  ;;  %581 = vmatprep.subr.bf16.mxu1 %v772_v1 }
  0x4e   :  { %608 = vmatpush3.bf16.msra.mxu0 %v642_v8  ;;  %623 = vmatprep.mubr.msk.bf16.mxu0 %vm773_vm0, %v772_v1  ;;  %p744_p3 = pnand %p743_p2, %p737_p13 }
  0x4f   :  { %609 = vmatprep.subr.bf16.mxu0 %v772_v1 }
  0x50   :  { %582 = vmatpush3.bf16.msra.mxu1 %v641_v9 }
  0x51   :  { %583 = vmatprep.subr.bf16.mxu1 %v772_v1  ;;  %v269_v60 = vstv %s525_s5 }
  0x52   :  { %610 = vmatpush3.bf16.msra.mxu0 %v644_v10 }
  0x53   :  { %611 = vmatprep.subr.bf16.mxu0 %v772_v1 }
  0x54   :  { %584 = vmatpush3.bf16.msra.mxu1 %v643_v11 }
  0x55   :  { %585 = vmatprep.subr.bf16.mxu1 %v772_v1 }
  0x56   :  { %612 = vmatpush3.bf16.msra.mxu0 %v646_v12 }
  0x57   :  { %613 = vmatprep.subr.bf16.mxu0 %v772_v1 }
  0x58   :  { %586 = vmatpush3.bf16.msra.mxu1 %v645_v13 }
  0x59   :  { %587 = vmatprep.subr.bf16.mxu1 %v772_v1 }
  0x5a   :  { %614 = vmatpush3.bf16.msra.mxu0 %v648_v14 }
  0x5b   :  { %615 = vmatprep.subr.bf16.mxu0 %v772_v1 }
  0x5c   :  { %588 = vmatpush3.bf16.msra.mxu1 %v647_v15 }
  0x5d   :  { %589 = vmatprep.subr.bf16.mxu1 %v772_v1 }
  0x5e   :  { %616 = vmatpush3.bf16.msra.mxu0 %v650_v16 }
  0x5f   :  { %617 = vmatprep.subr.bf16.mxu0 %v772_v1 }
  0x60   :  { %590 = vmatpush3.bf16.msra.mxu1 %v649_v17 }
  0x61   :  { %591 = vmatprep.subr.bf16.mxu1 %v772_v1 }
  0x62   :  { %618 = vmatpush3.bf16.msra.mxu0 %v652_v18 }
  0x63   :  { %619 = vmatprep.subr.bf16.mxu0 %v772_v1 }
  0x64   :  { %592 = vmatpush3.bf16.msra.mxu1 %v651_v19 }
  0x65   :  { %593 = vmatprep.subr.bf16.mxu1 %v772_v1 }
  0x66   :  { %620 = vmatpush3.bf16.msra.mxu0 %v654_v20 }
  0x67   :  { %621 = vmatprep.subr.bf16.mxu0 %v772_v1  ;;  %v478_v1 = vstv %s544_s28 }
  0x68   :  { %594 = vmatpush3.bf16.msra.mxu1 %v653_v21 }
  0x6a   :  { %622 = vmatpush3.bf16.msra.mxu0 %v655_v22 }
 0x11e   :  { %v139_v24 = vpop.f32.mrb[0].mxu1 }
 0x11f   :  { %v140_v26 = vadd.f32 %v512_v23, %v139_v24  ;;  %v577_v27 = vpop.f32.mrb[1].mxu1 }
 0x120   :  { %v142_v28 = vpop.f32.mrb[2].mxu1  ;;  %v344_v29 = vpop.f32.mrb[0].mxu0 }
 0x121   :  { %v145_v30 = vmax.f32 %v140_v26, 0.0  ;;  %v578_v31 = vpop.f32.mrb[3].mxu1  ;;  %v345_v32 = vadd.f32 %v529_v25, %v344_v29  ;;  %v605_v33 = vpop.f32.mrb[1].mxu0 }
 0x122   :  { %v347_v34 = vpop.f32.mrb[2].mxu0 }
 0x123   :  { %v146_v35 = vpack.c.bf16 %v145_v30, %v145_v30  ;;  %v350_v36 = vmax.f32 %v345_v32, 0.0  ;;  %v606_v37 = vpop.f32.mrb[3].mxu0 }
 0x125   :  { %v351_v38 = vpack.c.bf16 %v350_v36, %v350_v36  ;;  %596 = vmatmul.mubr.bf16.vlgmr.msra.gmra.mrb[4].mxu1 %v146_v35 }
 0x127   :  { %624 = vmatmul.mubr.bf16.vlgmr.msra.gmra.mrb[4].mxu0 %v351_v38 }
 0x1f8   :  { %v252_v40 = vpop.f32.mrb[4].mxu1 }
 0x1f9   :  { %v253_v42 = vadd.f32 %v516_v39, %v252_v40  ;;  %v597_v43 = vpop.f32.mrb[5].mxu1 }
 0x1fa   :  { %v255_v44 = vpop.f32.mrb[6].mxu1  ;;  %v459_v45 = vpop.f32.mrb[4].mxu0 }
 0x1fb   :  { %v598_v46 = vpop.f32.mrb[7].mxu1  ;;  %v460_v47 = vadd.f32 %v534_v41, %v459_v45  ;;  %v258_v48 = vmul.f32 %v253_v42, %v253_v42  ;;  %v625_v49 = vpop.f32.mrb[5].mxu0 }
 0x1fc   :  { %v462_v50 = vpop.f32.mrb[6].mxu0 }
 0x1fd   :  { %259 = vadd.xlane.f32.xlu0 %v258_v48  ;;  %v626_v51 = vpop.f32.mrb[7].mxu0  ;;  %v465_v52 = vmul.f32 %v460_v47, %v460_v47 }
 0x201   :  { %466 = vadd.xlane.f32.xlu0 %v465_v52 }
 0x28a   :  { %v260_v53 = vpop.xlane.xlu0 %259 }
 0x28b   :  { %v261_v54 = vmax.f32 %v260_v53, 1e-24 }
 0x28d   :  { %656 = vrsqrt.f32 %v261_v54 }
 0x28e   :  { %v467_v55 = vpop.xlane.xlu0 %466 }
 0x28f   :  { %v468_v56 = vmax.f32 %v467_v55, 1e-24 }
 0x291   :  { %658 = vrsqrt.f32 %v468_v56 }
 0x297   :  { %v657_v57 = vpop.eup %656 }
 0x298   :  { %v263_v58 = vmul.f32 %v657_v57, %v253_v42 }
 0x29a   :  { %v266_v5 = vmul.f32 %v265_v59, %v263_v58  ;;  %v270_v6 = vmul.f32 %v269_v60, %v263_v58  ;;  %v274_v7 = vmul.f32 %v273_v61, %v263_v58  ;;  %v278_v8 = vmul.f32 %v277_v62, %v263_v58 }
 0x29b   :  { %v659_v63 = vpop.eup %658 }
 0x29c   :  { %v470_v4 = vmul.f32 %v659_v63, %v460_v47 }
 0x29e   :  { %v473_v9 = vmul.f32 %v472_v0, %v470_v4  ;;  %v479_v10 = vmul.f32 %v478_v1, %v470_v4  ;;  %v485_v11 = vmul.f32 %v484_v2, %v470_v4  ;;  %v491_v12 = vmul.f32 %v490_v3, %v470_v4 }
 0x2a0   :  { %v475_v13 = vadd.f32 %v473_v9, %v266_v5  ;;  %v481_v14 = vadd.f32 %v479_v10, %v270_v6  ;;  %v487_v15 = vadd.f32 %v485_v11, %v274_v7  ;;  %v493_v16 = vadd.f32 %v491_v12, %v278_v8 }
 0x2a2   :  { %476 = vst [vmem:[#allocation10] sm:$0xff] %v475_v13  ;;  %482 = vst [vmem:[#allocation10 + $0x8] sm:$0xff] %v481_v14 }
 0x2a3   :  { %488 = vst [vmem:[#allocation10 + $0x10] sm:$0xff] %v487_v15  ;;  %494 = vst [vmem:[#allocation10 + $0x18] sm:$0xff] %v493_v16 }
 0x2a4   :  { %747 = shalt.err (!%p744_p3)
}
 0x2a5   :  { %s748_s13 = scalar_lea.hbm %s925_s6, 512 }
 0x2a6   :  { %p749_p4 = scmp.ne.s32.totalorder %s925_s6, %s748_s13  ;;  %p752_p5 = scmp.lt.u32.totalorder %s748_s13, %s925_s6 }
 0x2a8   :  { %p754_p6 = pnand %p752_p5, %p749_p4 }
 0x2aa   :  { %757 = shalt.err (!%p754_p6)
}
 0x2ab   :  { %504 = dma.vmem_to_hbm [thread:$0]  %s502_s7, 512, %s925_s6, [#allocation4]  }
 0x2ac   :  { %764 = dma.done.wait [#allocation4], 512  }
 0x2ad   :  { %765 = vsyncadd [#allocation4], 4294966784 }
 0x2ae   :  { %508 = vsyncpa [#allocation3], 1 }
 0x2af   :  { %509 = vsyncpa [#allocation8], 1 }
 0x2b0   :  { %510 = vsyncpa [#allocation4], 1 }
 0x2b1   :  { %511 = vsyncpa [#allocation5], 1 }

// kernel: tpu_custom_call.1
= control target key start
LH: loop header
LB: loop body
LE: loop exit
PB: predicated region body
PF: predicated region fallthrough
CT: control target
= control target key end

     0   :  { %11 = vsyncpa [#allocation5], 0  ;;  %s919_s0 = inlined_call_operand.hbm [shape: f32[2,4], index: 0, kind: input, shape index: {}]   ;;  %s920_s1 = inlined_call_operand.hbm [shape: bf16[2,8,32], index: 1, kind: input, shape index: {}]   ;;  %s921_s2 = inlined_call_operand.hbm [shape: bf16[2,32,128], index: 2, kind: input, shape index: {}]   ;;  %s922_s3 = inlined_call_operand.vmem [shape: f32[2,1,128], index: 3, kind: input, shape index: {}]   ;;  %s923_s4 = inlined_call_operand.hbm [shape: bf16[2,128,128], index: 4, kind: input, shape index: {}]   ;;  %s924_s5 = inlined_call_operand.vmem [shape: f32[2,1,128], index: 5, kind: input, shape index: {}]   ;;  %s925_s6 = inlined_call_operand.hbm [shape: f32[8,512], index: 6, kind: output, shape index: {}]  }
   0x1   :  { %12 = vsyncpa [#allocation3], 0 }
   0x2   :  { %13 = vsyncpa [#allocation8], 0 }
   0x3   :  { %14 = vsyncpa [#allocation4], 0  ;;  %s766_s21 = smov [#allocation7]   ;;  %s767_s23 = smov [#allocation6]  }
   0x4   :  { %s40_s22 = sshll.u32 %s766_s21, 4  ;;  %s28_s24 = sshll.u32 %s767_s23, 4  ;;  %s41_s22 = int_to_ptr.vmem [resolvable:$true] %s40_s22  ;;  %s29_s24 = int_to_ptr.vmem [resolvable:$true] %s28_s24 }
   0x5   :  { %s660_s27 = scalar_lea.hbm %s921_s2, 512 }
   0x6   :  { %p661_p0 = scmp.ne.s32.totalorder %s921_s2, %s660_s27  ;;  %p664_p1 = scmp.lt.u32.totalorder %s660_s27, %s921_s2 }
   0x8   :  { %p666_p2 = pnand %p664_p1, %p661_p0 }
   0xa   :  { %669 = shalt.err (!%p666_p2)
}
   0xb   :  { %s670_s8 = scalar_lea.vmem %s41_s22, 512  ;;  %p675_p4 = scmp.lt.s32.totalorder %s41_s22, %s41_s22 }
   0xc   :  { %p671_p3 = scmp.ne.s32.totalorder %s41_s22, %s670_s8  ;;  %p676_p5 = scmp.lt.s32.totalorder %s670_s8, %s670_s8 }
   0xe   :  { %p677_p6 = por %p676_p5, %p675_p4 }
  0x10   :  { %p678_p7 = pnand %p677_p6, %p671_p3 }
  0x12   :  { %681 = shalt.err (!%p678_p7)
}
  0x13   :  { %s768_s9 = smov 64   ;;  %s769_s10 = smov 4  }
  0x14   :  { %46 = dma.hbm_to_vmem [thread:$0]  %s921_s2, 512, %s41_s22, [#allocation8], %s768_s9, %s768_s9, %s769_s10  }
  0x15   :  { %s682_s15 = scalar_lea.hbm %s919_s0, 32 }
  0x16   :  { %p683_p8 = scmp.ne.s32.totalorder %s919_s0, %s682_s15  ;;  %p686_p9 = scmp.lt.u32.totalorder %s682_s15, %s919_s0 }
  0x18   :  { %p688_p10 = pnand %p686_p9, %p683_p8 }
  0x1a   :  { %691 = shalt.err (!%p688_p10)
}
  0x1b   :  { %s770_s20 = smov [#allocation2]   ;;  %s692_s25 = scalar_lea.hbm %s920_s1, 128 }
  0x1c   :  { %22 = dma.hbm_to_smem %s919_s0, 32, %s770_s20, [#allocation5]  }
  0x1d   :  { %p693_p11 = scmp.ne.s32.totalorder %s920_s1, %s692_s25  ;;  %p696_p12 = scmp.lt.u32.totalorder %s692_s25, %s920_s1 }
  0x1f   :  { %p698_p13 = pnand %p696_p12, %p693_p11 }
  0x21   :  { %701 = shalt.err (!%p698_p13)
}
  0x22   :  { %s702_s30 = scalar_lea.vmem %s29_s24, 128  ;;  %p707_p1 = scmp.lt.s32.totalorder %s29_s24, %s29_s24 }
  0x23   :  { %p703_p0 = scmp.ne.s32.totalorder %s29_s24, %s702_s30  ;;  %p708_p2 = scmp.lt.s32.totalorder %s702_s30, %s702_s30 }
  0x25   :  { %p709_p3 = por %p708_p2, %p707_p1 }
  0x27   :  { %p710_p4 = pnand %p709_p3, %p703_p0 }
  0x29   :  { %713 = shalt.err (!%p710_p4)
}
  0x2a   :  { %34 = dma.hbm_to_vmem [thread:$0]  %s920_s1, 128, %s29_s24, [#allocation3], %s768_s9, %s768_s9, %s769_s10  }
  0x2b   :  { %s771_s8 = smov [#allocation9]   ;;  %s714_s14 = scalar_lea.hbm %s923_s4, 2048 }
  0x2c   :  { %s54_s11 = sshll.u32 %s771_s8, 4  ;;  %p715_p5 = scmp.ne.s32.totalorder %s923_s4, %s714_s14  ;;  %s55_s11 = int_to_ptr.vmem [resolvable:$true] %s54_s11 }
  0x2d   :  { %p718_p6 = scmp.lt.u32.totalorder %s714_s14, %s923_s4 }
  0x2f   :  { %p720_p7 = pnand %p718_p6, %p715_p5 }
  0x31   :  { %723 = shalt.err (!%p720_p7)
}
  0x32   :  { %s724_s19 = scalar_lea.vmem %s55_s11, 2048  ;;  %p729_p9 = scmp.lt.s32.totalorder %s55_s11, %s55_s11 }
  0x33   :  { %p725_p8 = scmp.ne.s32.totalorder %s55_s11, %s724_s19  ;;  %p730_p10 = scmp.lt.s32.totalorder %s724_s19, %s724_s19 }
  0x35   :  { %p731_p11 = por %p730_p10, %p729_p9 }
  0x37   :  { %p732_p12 = pnand %p731_p11, %p725_p8 }
  0x39   :  { %735 = shalt.err (!%p732_p12)
}
  0x3a   :  { %60 = dma.hbm_to_vmem [thread:$0]  %s923_s4, 2048, %s55_s11, [#allocation8], %s768_s9, %s768_s9, %s769_s10  }
  0x3b   :  { %758 = dma.done.wait [#allocation5], 32  }
  0x3c   :  { %759 = vsyncadd [#allocation5], 4294967264 }
  0x3d   :  { %760 = dma.done.wait [#allocation3], 128  }
  0x3e   :  { %761 = vsyncadd [#allocation3], 4294967168 }
  0x3f   :  { %762 = dma.done.wait [#allocation8], 2560  }
  0x40   :  { %763 = vsyncadd [#allocation8], 4294964736 }
  0x41   :  { %75 = sfence }
  0x42   :  { %v636_v0 = vld [vmem:[#allocation7] sm:$0xff]   ;;  %v772_v1 = vmov 0.0   ;;  %v637_v2 = vld [vmem:[#allocation7 + $0x8] sm:$0xff]   ;;  %v638_v3 = vld [vmem:[#allocation7 + $0x10] sm:$0xff]   ;;  %vm773_vm0 = vmmov 0   ;;  %vm101_vm1 = vcmask 261120  }
  0x43   :  { %571 = vmatprep.subr.bf16.mxu1 %v772_v1  ;;  %599 = vmatprep.subr.bf16.mxu0 %v772_v1  ;;  %v639_v4 = vld [vmem:[#allocation7 + $0x18] sm:$0xff]   ;;  %v640_v6 = vld [vmem:[#allocation9] sm:$0xff]   ;;  %v641_v9 = vld [vmem:[#allocation9 + $0x8] sm:$0xff]   ;;  %s264_s22 = sld [smem:[#allocation2]]  ;;  %s526_s25 = sld [smem:[#allocation2 + $0x2]] }
  0x44   :  { %572 = vmatpush3.bf16.msra.mxu1 %v636_v0  ;;  %575 = vmatprep.mubr.msk.bf16.mxu1 %vm773_vm0, %v772_v1  ;;  %v77_v5 = vld [vmem:[#allocation6] sm:$0xf]  ;;  %v281_v7 = vld [vmem:[#allocation6 + $0x4] sm:$0xf]  ;;  %v642_v8 = vld [vmem:[#allocation9 + $0x40] sm:$0xff]   ;;  %s527_s26 = sld [smem:[#allocation2 + $0x3]] }
  0x45   :  { %573 = vmatprep.subr.bf16.mxu1 %v772_v1  ;;  %603 = vmatprep.mubr.msk.bf16.mxu0 %vm773_vm0, %v772_v1  ;;  %v644_v10 = vld [vmem:[#allocation9 + $0x48] sm:$0xff]   ;;  %v643_v11 = vld [vmem:[#allocation9 + $0x10] sm:$0xff]   ;;  %v645_v13 = vld [vmem:[#allocation9 + $0x18] sm:$0xff]   ;;  %s543_s27 = sld [smem:[#allocation2 + $0x80]]  ;;  %s544_s28 = sld [smem:[#allocation2 + $0x81]] }
  0x46   :  { %600 = vmatpush3.bf16.msra.mxu0 %v638_v3  ;;  %v646_v12 = vld [vmem:[#allocation9 + $0x50] sm:$0xff]   ;;  %v648_v14 = vld [vmem:[#allocation9 + $0x58] sm:$0xff]   ;;  %v647_v15 = vld [vmem:[#allocation9 + $0x20] sm:$0xff]   ;;  %s545_s29 = sld [smem:[#allocation2 + $0x82]]  ;;  %s546_s30 = sld [smem:[#allocation2 + $0x83]] }
  0x47   :  { %601 = vmatprep.subr.bf16.mxu0 %v772_v1  ;;  %v650_v16 = vld [vmem:[#allocation9 + $0x60] sm:$0xff]   ;;  %v649_v17 = vld [vmem:[#allocation9 + $0x28] sm:$0xff]   ;;  %v651_v19 = vld [vmem:[#allocation9 + $0x30] sm:$0xff]   ;;  %s774_s0 = smov [#allocation10]  }
  0x48   :  { %574 = vmatpush3.bf16.msra.mxu1 %v637_v2  ;;  %v652_v18 = vld [vmem:[#allocation9 + $0x68] sm:$0xff]   ;;  %v654_v20 = vld [vmem:[#allocation9 + $0x70] sm:$0xff]   ;;  %v653_v21 = vld [vmem:[#allocation9 + $0x38] sm:$0xff]   ;;  %s501_s7 = sshll.u32 %s774_s0, 4  ;;  %s502_s7 = int_to_ptr.vmem [resolvable:$true] %s501_s7 }
  0x49   :  { %579 = vmatprep.subr.bf16.mxu1 %v772_v1  ;;  %v655_v22 = vld [vmem:[#allocation9 + $0x78] sm:$0xff]   ;;  %v265_v59 = vstv %s264_s22  ;;  %v273_v61 = vstv %s526_s25  ;;  %s736_s8 = scalar_lea.vmem %s502_s7, 512  ;;  %p741_p0 = scmp.lt.s32.totalorder %s502_s7, %s502_s7 }
  0x4a   :  { %602 = vmatpush3.bf16.msra.mxu0 %v639_v4  ;;  %v512_v23 = vld [vmem:[%s922_s3] ss:$0 sm:$0xff]  ;;  %v529_v25 = vld [vmem:[%s922_s3 + $0x1] ss:$0 sm:$0xff]  ;;  %v277_v62 = vstv %s527_s26  ;;  %p737_p13 = scmp.ne.s32.totalorder %s502_s7, %s736_s8  ;;  %p742_p1 = scmp.lt.s32.totalorder %s736_s8, %s736_s8 }
  0x4b   :  { %576 = vmatmul.mubr.msk.bf16.vlgmr.msra.gmra.mrb[0].mxu1 %vm101_vm1, %v77_v5  ;;  %607 = vmatprep.subr.bf16.mxu0 %v772_v1  ;;  %v516_v39 = vld [vmem:[%s924_s5] ss:$0 sm:$0xff]  ;;  %v534_v41 = vld [vmem:[%s924_s5 + $0x1] ss:$0 sm:$0xff]  ;;  %s525_s5 = sld [smem:[#allocation2 + $0x1]]  ;;  %v472_v0 = vstv %s543_s27 }
  0x4c   :  { %580 = vmatpush3.bf16.msra.mxu1 %v640_v6  ;;  %595 = vmatprep.mubr.msk.bf16.mxu1 %vm773_vm0, %v772_v1  ;;  %v484_v2 = vstv %s545_s29  ;;  %v490_v3 = vstv %s546_s30  ;;  %p743_p2 = por %p742_p1, %p741_p0 }
  0x4d   :  { %604 = vmatmul.mubr.msk.bf16.vlgmr.msra.gmra.mrb[0].mxu0 %vm101_vm1, %v281_v7  ;;  %581 = vmatprep.subr.bf16.mxu1 %v772_v1 }
  0x4e   :  { %608 = vmatpush3.bf16.msra.mxu0 %v642_v8  ;;  %623 = vmatprep.mubr.msk.bf16.mxu0 %vm773_vm0, %v772_v1  ;;  %p744_p3 = pnand %p743_p2, %p737_p13 }
  0x4f   :  { %609 = vmatprep.subr.bf16.mxu0 %v772_v1 }
  0x50   :  { %582 = vmatpush3.bf16.msra.mxu1 %v641_v9 }
  0x51   :  { %583 = vmatprep.subr.bf16.mxu1 %v772_v1  ;;  %v269_v60 = vstv %s525_s5 }
  0x52   :  { %610 = vmatpush3.bf16.msra.mxu0 %v644_v10 }
  0x53   :  { %611 = vmatprep.subr.bf16.mxu0 %v772_v1 }
  0x54   :  { %584 = vmatpush3.bf16.msra.mxu1 %v643_v11 }
  0x55   :  { %585 = vmatprep.subr.bf16.mxu1 %v772_v1 }
  0x56   :  { %612 = vmatpush3.bf16.msra.mxu0 %v646_v12 }
  0x57   :  { %613 = vmatprep.subr.bf16.mxu0 %v772_v1 }
  0x58   :  { %586 = vmatpush3.bf16.msra.mxu1 %v645_v13 }
  0x59   :  { %587 = vmatprep.subr.bf16.mxu1 %v772_v1 }
  0x5a   :  { %614 = vmatpush3.bf16.msra.mxu0 %v648_v14 }
  0x5b   :  { %615 = vmatprep.subr.bf16.mxu0 %v772_v1 }
  0x5c   :  { %588 = vmatpush3.bf16.msra.mxu1 %v647_v15 }
  0x5d   :  { %589 = vmatprep.subr.bf16.mxu1 %v772_v1 }
  0x5e   :  { %616 = vmatpush3.bf16.msra.mxu0 %v650_v16 }
  0x5f   :  { %617 = vmatprep.subr.bf16.mxu0 %v772_v1 }
  0x60   :  { %590 = vmatpush3.bf16.msra.mxu1 %v649_v17 }
  0x61   :  { %591 = vmatprep.subr.bf16.mxu1 %v772_v1 }
  0x62   :  { %618 = vmatpush3.bf16.msra.mxu0 %v652_v18 }
  0x63   :  { %619 = vmatprep.subr.bf16.mxu0 %v772_v1 }
  0x64   :  { %592 = vmatpush3.bf16.msra.mxu1 %v651_v19 }
  0x65   :  { %593 = vmatprep.subr.bf16.mxu1 %v772_v1 }
  0x66   :  { %620 = vmatpush3.bf16.msra.mxu0 %v654_v20 }
  0x67   :  { %621 = vmatprep.subr.bf16.mxu0 %v772_v1  ;;  %v478_v1 = vstv %s544_s28 }
  0x68   :  { %594 = vmatpush3.bf16.msra.mxu1 %v653_v21 }
  0x6a   :  { %622 = vmatpush3.bf16.msra.mxu0 %v655_v22 }
 0x11e   :  { %v139_v24 = vpop.f32.mrb[0].mxu1 }
 0x11f   :  { %v140_v26 = vadd.f32 %v512_v23, %v139_v24  ;;  %v577_v27 = vpop.f32.mrb[1].mxu1 }
 0x120   :  { %v142_v28 = vpop.f32.mrb[2].mxu1  ;;  %v344_v29 = vpop.f32.mrb[0].mxu0 }
 0x121   :  { %v145_v30 = vmax.f32 %v140_v26, 0.0  ;;  %v578_v31 = vpop.f32.mrb[3].mxu1  ;;  %v345_v32 = vadd.f32 %v529_v25, %v344_v29  ;;  %v605_v33 = vpop.f32.mrb[1].mxu0 }
 0x122   :  { %v347_v34 = vpop.f32.mrb[2].mxu0 }
 0x123   :  { %v146_v35 = vpack.c.bf16 %v145_v30, %v145_v30  ;;  %v350_v36 = vmax.f32 %v345_v32, 0.0  ;;  %v606_v37 = vpop.f32.mrb[3].mxu0 }
 0x125   :  { %v351_v38 = vpack.c.bf16 %v350_v36, %v350_v36  ;;  %596 = vmatmul.mubr.bf16.vlgmr.msra.gmra.mrb[4].mxu1 %v146_v35 }
 0x127   :  { %624 = vmatmul.mubr.bf16.vlgmr.msra.gmra.mrb[4].mxu0 %v351_v38 }
 0x1f8   :  { %v252_v40 = vpop.f32.mrb[4].mxu1 }
 0x1f9   :  { %v253_v42 = vadd.f32 %v516_v39, %v252_v40  ;;  %v597_v43 = vpop.f32.mrb[5].mxu1 }
 0x1fa   :  { %v255_v44 = vpop.f32.mrb[6].mxu1  ;;  %v459_v45 = vpop.f32.mrb[4].mxu0 }
 0x1fb   :  { %v598_v46 = vpop.f32.mrb[7].mxu1  ;;  %v460_v47 = vadd.f32 %v534_v41, %v459_v45  ;;  %v258_v48 = vmul.f32 %v253_v42, %v253_v42  ;;  %v625_v49 = vpop.f32.mrb[5].mxu0 }
 0x1fc   :  { %v462_v50 = vpop.f32.mrb[6].mxu0 }
 0x1fd   :  { %259 = vadd.xlane.f32.xlu0 %v258_v48  ;;  %v626_v51 = vpop.f32.mrb[7].mxu0  ;;  %v465_v52 = vmul.f32 %v460_v47, %v460_v47 }
 0x201   :  { %466 = vadd.xlane.f32.xlu0 %v465_v52 }
 0x28a   :  { %v260_v53 = vpop.xlane.xlu0 %259 }
 0x28b   :  { %v261_v54 = vmax.f32 %v260_v53, 1e-24 }
 0x28d   :  { %656 = vrsqrt.f32 %v261_v54 }
 0x28e   :  { %v467_v55 = vpop.xlane.xlu0 %466 }
 0x28f   :  { %v468_v56 = vmax.f32 %v467_v55, 1e-24 }
 0x291   :  { %658 = vrsqrt.f32 %v468_v56 }
 0x297   :  { %v657_v57 = vpop.eup %656 }
 0x298   :  { %v263_v58 = vmul.f32 %v657_v57, %v253_v42 }
 0x29a   :  { %v266_v5 = vmul.f32 %v265_v59, %v263_v58  ;;  %v270_v6 = vmul.f32 %v269_v60, %v263_v58  ;;  %v274_v7 = vmul.f32 %v273_v61, %v263_v58  ;;  %v278_v8 = vmul.f32 %v277_v62, %v263_v58 }
 0x29b   :  { %v659_v63 = vpop.eup %658 }
 0x29c   :  { %v470_v4 = vmul.f32 %v659_v63, %v460_v47 }
 0x29e   :  { %v473_v9 = vmul.f32 %v472_v0, %v470_v4  ;;  %v479_v10 = vmul.f32 %v478_v1, %v470_v4  ;;  %v485_v11 = vmul.f32 %v484_v2, %v470_v4  ;;  %v491_v12 = vmul.f32 %v490_v3, %v470_v4 }
 0x2a0   :  { %v475_v13 = vadd.f32 %v473_v9, %v266_v5  ;;  %v481_v14 = vadd.f32 %v479_v10, %v270_v6  ;;  %v487_v15 = vadd.f32 %v485_v11, %v274_v7  ;;  %v493_v16 = vadd.f32 %v491_v12, %v278_v8 }
 0x2a2   :  { %476 = vst [vmem:[#allocation10] sm:$0xff] %v475_v13  ;;  %482 = vst [vmem:[#allocation10 + $0x8] sm:$0xff] %v481_v14 }
 0x2a3   :  { %488 = vst [vmem:[#allocation10 + $0x10] sm:$0xff] %v487_v15  ;;  %494 = vst [vmem:[#allocation10 + $0x18] sm:$0xff] %v493_v16 }
 0x2a4   :  { %747 = shalt.err (!%p744_p3)
}
 0x2a5   :  { %s748_s13 = scalar_lea.hbm %s925_s6, 512 }
 0x2a6   :  { %p749_p4 = scmp.ne.s32.totalorder %s925_s6, %s748_s13  ;;  %p752_p5 = scmp.lt.u32.totalorder %s748_s13, %s925_s6 }
 0x2a8   :  { %p754_p6 = pnand %p752_p5, %p749_p4 }
 0x2aa   :  { %757 = shalt.err (!%p754_p6)
}
 0x2ab   :  { %504 = dma.vmem_to_hbm [thread:$0]  %s502_s7, 512, %s925_s6, [#allocation4]  }
 0x2ac   :  { %764 = dma.done.wait [#allocation4], 512  }
 0x2ad   :  { %765 = vsyncadd [#allocation4], 4294966784 }
 0x2ae   :  { %508 = vsyncpa [#allocation3], 1 }
 0x2af   :  { %509 = vsyncpa [#allocation8], 1 }
 0x2b0   :  { %510 = vsyncpa [#allocation4], 1 }
 0x2b1   :  { %511 = vsyncpa [#allocation5], 1 }

</bundles_post_ra>
